<compile_context>
chip_gen: v5e
topology: v5e:2x2
jax: 0.10.0
libtpu: 0.0.40
codegen_flags: <defaults>
</compile_context>

<pallas_src>
import jax
import jax.numpy as jnp
from jax.experimental import pallas as pl
from jax.experimental.pallas import tpu as pltpu

# ---------------- problem sizes (small, consistent with the module) ----------
N, CIN, COUT = 2, 4, 32          # GroupNorm(16, planes) => planes % 16 == 0
D, H, W = 4, 8, 8
RATE = 2                          # dilation/padding rate (1, rate, rate)
GROUPS = 16
CG = COUT // GROUPS               # channels per group
EPS = 1e-5                        # PyTorch GroupNorm default eps
DHW = D * H * W                   # 256
KTAPS = 27 * CIN                  # 108
KPAD = 128                        # contraction dim padded to lane width
CPAD = 128                        # output channels padded to lane width


# ------------------------------- Pallas kernel -------------------------------
def aspp_kernel(x_ref, w_ref, p_ref, a_ref, o_ref):
    # x_ref : [1, DHW, KPAD]   im2col operand for one sample (zero-padded K)
    # w_ref : [KPAD, CPAD]     tap-major conv weight (zero-padded)
    # p_ref : [8, CPAD]        row 0 = conv bias, row 1 = GN gamma, row 2 = GN beta
    # a_ref : [CPAD, CPAD]     group-averaging matrix (1/CG within real groups)
    # o_ref : [1, DHW, CPAD]
    # Single well-shaped MXU pass: [DHW, KPAD] x [KPAD, CPAD].
    y = jnp.dot(x_ref[0], w_ref[...], preferred_element_type=jnp.float32)

    p = p_ref[...]
    y = y + p[0:1, :]                                # conv bias

    # GroupNorm(16, COUT): per-sample stats over (spatial, channels-in-group).
    # Per-channel spatial moments, then broadcast to group moments via the
    # constant averaging matrix A (avoids lane->sublane reshapes).
    mu_c = jnp.mean(y, axis=0, keepdims=True)        # [1, CPAD]
    ms_c = jnp.mean(y * y, axis=0, keepdims=True)    # [1, CPAD]
    mu = jnp.dot(mu_c, a_ref[...], preferred_element_type=jnp.float32)
    ms = jnp.dot(ms_c, a_ref[...], preferred_element_type=jnp.float32)
    var = ms - mu * mu                               # biased variance (torch GN)
    inv = jax.lax.rsqrt(var + EPS)

    out = (y - mu) * inv * p[1:2, :] + p[2:3, :]
    o_ref[0] = out.astype(o_ref.dtype)


# ------------------------------- wrapper --------------------------------------
def aspp_forward(x_ncdhw, w_oidhw, bias, gamma, beta):
    # channels-last + zero-pad for the dilated 3x3x3 window
    x = jnp.transpose(x_ncdhw, (0, 2, 3, 4, 1))                     # NDHWC
    xp = jnp.pad(x, ((0, 0), (1, 1), (RATE, RATE), (RATE, RATE), (0, 0)))

    # im2col in the wrapper: gather the 27 dilated taps -> [N, DHW, 27*CIN]
    taps = []
    for kd in range(3):
        for kh in range(3):
            for kw in range(3):
                taps.append(xp[:, kd:kd + D,
                               kh * RATE:kh * RATE + H,
                               kw * RATE:kw * RATE + W, :])          # [N,D,H,W,CIN]
    col = jnp.stack(taps, axis=4)                                    # [N,D,H,W,27,CIN]
    col = col.reshape(N, DHW, KTAPS)
    col = jnp.pad(col, ((0, 0), (0, 0), (0, KPAD - KTAPS)))          # K -> 128

    # weight: OIDHW -> [27*CIN, COUT], tap-major to match the im2col layout
    w = jnp.transpose(w_oidhw, (2, 3, 4, 1, 0)).reshape(KTAPS, COUT)
    w = jnp.pad(w, ((0, KPAD - KTAPS), (0, CPAD - COUT)))            # -> [128,128]

    # pack bias / gamma / beta into one [8, CPAD] block (padded lanes are zero)
    params = jnp.zeros((8, CPAD), jnp.float32)
    params = params.at[0, :COUT].set(bias)
    params = params.at[1, :COUT].set(gamma)
    params = params.at[2, :COUT].set(beta)

    # constant group-averaging matrix; zero outside the real 32 channels
    ci = jnp.arange(CPAD)[:, None] // CG
    cj = jnp.arange(CPAD)[None, :] // CG
    real = jnp.arange(CPAD) < COUT
    A = jnp.where((ci == cj) & real[:, None] & real[None, :],
                  jnp.float32(1.0 / CG), jnp.float32(0.0))

    out = pl.pallas_call(
        aspp_kernel,
        out_shape=jax.ShapeDtypeStruct((N, DHW, CPAD), jnp.float32),
        grid_spec=pltpu.PrefetchScalarGridSpec(
            num_scalar_prefetch=0,
            grid=(N,),
            in_specs=[
                pl.BlockSpec((1, DHW, KPAD), lambda n: (n, 0, 0)),
                pl.BlockSpec((KPAD, CPAD), lambda n: (0, 0)),
                pl.BlockSpec((8, CPAD), lambda n: (0, 0)),
                pl.BlockSpec((CPAD, CPAD), lambda n: (0, 0)),
            ],
            out_specs=pl.BlockSpec((1, DHW, CPAD), lambda n: (n, 0, 0)),
        ),
        compiler_params=pltpu.CompilerParams(
            dimension_semantics=("parallel",)),   # feeds both TCs on v7x
    )(col, w, params, A)

    out = out[:, :, :COUT].reshape(N, D, H, W, COUT)
    return jnp.transpose(out, (0, 4, 1, 2, 3))                      # NCDHW


# ------------------------------ pure-JAX reference ----------------------------
def ref_forward(x, w, b, gamma, beta):
    y = jax.lax.conv_general_dilated(
        x, w, window_strides=(1, 1, 1),
        padding=((1, 1), (RATE, RATE), (RATE, RATE)),
        rhs_dilation=(1, RATE, RATE),
        dimension_numbers=('NCDHW', 'OIDHW', 'NCDHW'))
    y = y + b[None, :, None, None, None]
    yg = y.reshape(N, GROUPS, -1)
    mean = yg.mean(axis=2, keepdims=True)
    var = yg.var(axis=2, keepdims=True)                 # biased, as in torch
    yn = ((yg - mean) * jax.lax.rsqrt(var + EPS)).reshape(y.shape)
    return yn * gamma[None, :, None, None, None] + beta[None, :, None, None, None]


# ----------------------------------- main --------------------------------------
if __name__ == "__main__":
    key = jax.random.PRNGKey(0)
    k_w, k_b, k_x = jax.random.split(key, 3)

    # Conv3d weight: kaiming_normal_ (fan_in mode) => std = sqrt(2 / fan_in)
    fan_in = CIN * 3 * 3 * 3
    w_oidhw = jax.random.normal(k_w, (COUT, CIN, 3, 3, 3), jnp.float32) * (2.0 / fan_in) ** 0.5
    # Conv3d bias: PyTorch default uniform(-1/sqrt(fan_in), 1/sqrt(fan_in))
    bound = 1.0 / (fan_in ** 0.5)
    bias = jax.random.uniform(k_b, (COUT,), jnp.float32, -bound, bound)
    # GroupNorm affine params: default init (weight=1, bias=0)
    gamma = jnp.ones((COUT,), jnp.float32)
    beta = jnp.zeros((COUT,), jnp.float32)

    x = jax.random.normal(k_x, (N, CIN, D, H, W), jnp.float32)

    out = aspp_forward(x, w_oidhw, bias, gamma, beta)
    out = jax.block_until_ready(out)

    ref = ref_forward(x, w_oidhw, bias, gamma, beta)
    assert out.shape == (N, COUT, D, H, W)
    max_err = float(jnp.max(jnp.abs(out - ref)))
    assert max_err < 1e-3, f"mismatch vs reference: {max_err}"

    print("KERNEL_OK")
</pallas_src>

<mosaic_0001>
module attributes {stable_mosaic.version = 11 : i64} {
  func.func @aspp_kernel(%arg0: i32, %arg1: memref<1x256x128xf32, #tpu.memory_space<vmem>>, %arg2: memref<128x128xf32, #tpu.memory_space<vmem>>, %arg3: memref<8x128xf32, #tpu.memory_space<vmem>>, %arg4: memref<128x128xf32, #tpu.memory_space<vmem>>, %arg5: memref<1x256x128xf32, #tpu.memory_space<vmem>>) attributes {dimension_semantics = [#tpu.dimension_semantics<parallel>], iteration_bounds = array<i64: 2>, scalar_prefetch = 0 : i64, scratch_operands = 0 : i64, tpu.core_type = #tpu.core_type<tc>, window_params = [{transform_indices = @transform_0, window_bounds = array<i64: 1, 256, 128>}, {pipeline_mode = #tpu.pipeline_mode<synchronous>, transform_indices = @transform_1, window_bounds = array<i64: 128, 128>}, {pipeline_mode = #tpu.pipeline_mode<synchronous>, transform_indices = @transform_2, window_bounds = array<i64: 8, 128>}, {pipeline_mode = #tpu.pipeline_mode<synchronous>, transform_indices = @transform_3, window_bounds = array<i64: 128, 128>}, {transform_indices = @transform_4, window_bounds = array<i64: 1, 256, 128>}]} {
    %c0 = arith.constant 0 : index
    %c0_0 = arith.constant 0 : index
    %c0_1 = arith.constant 0 : index
    %0 = vector.load %arg1[%c0, %c0_0, %c0_1] : memref<1x256x128xf32, #tpu.memory_space<vmem>>, vector<1x256x128xf32>
    %1 = vector.shape_cast %0 : vector<1x256x128xf32> to vector<256x128xf32>
    %c0_2 = arith.constant 0 : index
    %c0_3 = arith.constant 0 : index
    %2 = vector.load %arg2[%c0_2, %c0_3] : memref<128x128xf32, #tpu.memory_space<vmem>>, vector<128x128xf32>
    %cst = arith.constant dense<0.000000e+00> : vector<256x128xf32>
    %3 = tpu.matmul %1, %2, %cst {dimension_numbers = #tpu.dot_dimension_numbers<[1], [0], [0], [1], [0, 0, 1, 1], [], []>} : vector<256x128xf32>, vector<128x128xf32>, vector<256x128xf32> -> vector<256x128xf32>
    %c0_4 = arith.constant 0 : index
    %c0_5 = arith.constant 0 : index
    %4 = vector.load %arg3[%c0_4, %c0_5] : memref<8x128xf32, #tpu.memory_space<vmem>>, vector<8x128xf32>
    %5 = vector.extract_strided_slice %4 {offsets = [0, 0], sizes = [1, 128], strides = [1, 1]} : vector<8x128xf32> to vector<1x128xf32>
    %6 = vector.broadcast %5 : vector<1x128xf32> to vector<256x128xf32>
    %7 = arith.addf %3, %6 : vector<256x128xf32>
    %cst_6 = arith.constant dense<0.000000e+00> : vector<128xf32>
    %8 = vector.multi_reduction <add>, %7, %cst_6 [0] : vector<256x128xf32> to vector<128xf32>
    %9 = vector.shape_cast %8 : vector<128xf32> to vector<1x128xf32>
    %cst_7 = arith.constant 2.560000e+02 : f32
    %10 = vector.broadcast %cst_7 : f32 to vector<1x128xf32>
    %11 = arith.divf %9, %10 : vector<1x128xf32>
    %12 = arith.mulf %7, %7 : vector<256x128xf32>
    %cst_8 = arith.constant dense<0.000000e+00> : vector<128xf32>
    %13 = vector.multi_reduction <add>, %12, %cst_8 [0] : vector<256x128xf32> to vector<128xf32>
    %14 = vector.shape_cast %13 : vector<128xf32> to vector<1x128xf32>
    %cst_9 = arith.constant 2.560000e+02 : f32
    %15 = vector.broadcast %cst_9 : f32 to vector<1x128xf32>
    %16 = arith.divf %14, %15 : vector<1x128xf32>
    %c0_10 = arith.constant 0 : index
    %c0_11 = arith.constant 0 : index
    %17 = vector.load %arg4[%c0_10, %c0_11] : memref<128x128xf32, #tpu.memory_space<vmem>>, vector<128x128xf32>
    %cst_12 = arith.constant dense<0.000000e+00> : vector<1x128xf32>
    %18 = tpu.matmul %11, %17, %cst_12 {dimension_numbers = #tpu.dot_dimension_numbers<[1], [0], [0], [1], [0, 0, 1, 1], [], []>} : vector<1x128xf32>, vector<128x128xf32>, vector<1x128xf32> -> vector<1x128xf32>
    %c0_13 = arith.constant 0 : index
    %c0_14 = arith.constant 0 : index
    %19 = vector.load %arg4[%c0_13, %c0_14] : memref<128x128xf32, #tpu.memory_space<vmem>>, vector<128x128xf32>
    %cst_15 = arith.constant dense<0.000000e+00> : vector<1x128xf32>
    %20 = tpu.matmul %16, %19, %cst_15 {dimension_numbers = #tpu.dot_dimension_numbers<[1], [0], [0], [1], [0, 0, 1, 1], [], []>} : vector<1x128xf32>, vector<128x128xf32>, vector<1x128xf32> -> vector<1x128xf32>
    %21 = arith.mulf %18, %18 : vector<1x128xf32>
    %22 = arith.subf %20, %21 : vector<1x128xf32>
    %cst_16 = arith.constant 9.99999974E-6 : f32
    %23 = vector.broadcast %cst_16 : f32 to vector<1x128xf32>
    %24 = arith.addf %22, %23 : vector<1x128xf32>
    %25 = math.rsqrt %24 : vector<1x128xf32>
    %26 = vector.broadcast %18 : vector<1x128xf32> to vector<256x128xf32>
    %27 = arith.subf %7, %26 : vector<256x128xf32>
    %28 = vector.broadcast %25 : vector<1x128xf32> to vector<256x128xf32>
    %29 = arith.mulf %27, %28 : vector<256x128xf32>
    %30 = vector.extract_strided_slice %4 {offsets = [1, 0], sizes = [1, 128], strides = [1, 1]} : vector<8x128xf32> to vector<1x128xf32>
    %31 = vector.broadcast %30 : vector<1x128xf32> to vector<256x128xf32>
    %32 = arith.mulf %29, %31 : vector<256x128xf32>
    %33 = vector.extract_strided_slice %4 {offsets = [2, 0], sizes = [1, 128], strides = [1, 1]} : vector<8x128xf32> to vector<1x128xf32>
    %34 = vector.broadcast %33 : vector<1x128xf32> to vector<256x128xf32>
    %35 = arith.addf %32, %34 : vector<256x128xf32>
    %c0_17 = arith.constant 0 : index
    %c0_18 = arith.constant 0 : index
    %c0_19 = arith.constant 0 : index
    %36 = vector.load %arg5[%c0_17, %c0_18, %c0_19] : memref<1x256x128xf32, #tpu.memory_space<vmem>>, vector<1x256x128xf32>
    %37 = vector.shape_cast %36 : vector<1x256x128xf32> to vector<256x128xf32>
    %38 = vector.shape_cast %35 : vector<256x128xf32> to vector<1x256x128xf32>
    tpu.vector_store %arg5[%c0_17, %c0_18, %c0_19], %38 {strides = array<i32>} : memref<1x256x128xf32, #tpu.memory_space<vmem>>, vector<1x256x128xf32>,
    return
  }
  func.func @transform_0(%arg0: i32) -> (i32, i32, i32) {
    %c0_i32 = arith.constant 0 : i32
    %c0_i32_0 = arith.constant 0 : i32
    %c0_i32_1 = arith.constant 0 : i32
    return %arg0, %c0_i32, %c0_i32_0 : i32, i32, i32
  }
  func.func @transform_1(%arg0: i32) -> (i32, i32) {
    %c0_i32 = arith.constant 0 : i32
    %c0_i32_0 = arith.constant 0 : i32
    %c0_i32_1 = arith.constant 0 : i32
    return %c0_i32, %c0_i32_0 : i32, i32
  }
  func.func @transform_2(%arg0: i32) -> (i32, i32) {
    %c0_i32 = arith.constant 0 : i32
    %c0_i32_0 = arith.constant 0 : i32
    %c0_i32_1 = arith.constant 0 : i32
    return %c0_i32, %c0_i32_0 : i32, i32
  }
  func.func @transform_3(%arg0: i32) -> (i32, i32) {
    %c0_i32 = arith.constant 0 : i32
    %c0_i32_0 = arith.constant 0 : i32
    %c0_i32_1 = arith.constant 0 : i32
    return %c0_i32, %c0_i32_0 : i32, i32
  }
  func.func @transform_4(%arg0: i32) -> (i32, i32, i32) {
    %c0_i32 = arith.constant 0 : i32
    %c0_i32_0 = arith.constant 0 : i32
    %c0_i32_1 = arith.constant 0 : i32
    return %arg0, %c0_i32, %c0_i32_0 : i32, i32, i32
  }
}

</mosaic_0001>

<bundles_post_ra>
// kernel: tpu_custom_call.1
= control target key start
LH: loop header
LB: loop body
LE: loop exit
PB: predicated region body
PF: predicated region fallthrough
CT: control target
= control target key end

     0   :  { %9 = vsyncpa [#allocation3], 0  ;;  %s1935_s0 = inlined_call_operand.hbm [shape: f32[2,256,128], index: 0, kind: input, shape index: {}]   ;;  %s1936_s1 = inlined_call_operand.hbm [shape: f32[128,128], index: 1, kind: input, shape index: {}]   ;;  %s1937_s2 = inlined_call_operand.hbm [shape: f32[8,128], index: 2, kind: input, shape index: {}]   ;;  %s1938_s3 = inlined_call_operand.hbm [shape: f32[128,128], index: 3, kind: input, shape index: {}]   ;;  %s1939_s4 = inlined_call_operand.hbm [shape: f32[2,256,128], index: 4, kind: output, shape index: {}]  }
   0x1   :  { %11 = vsyncpa [#allocation3 + $0x1], 0 }
   0x2   :  { %12 = vsyncpa [#allocation6], 0 }
   0x3   :  { %13 = vsyncpa [#allocation9], 0 }
   0x4   :  { %14 = vsyncpa [#allocation4], 0 }
   0x5   :  { %16 = vsyncpa [#allocation4 + $0x1], 0  ;;  %s1280_s15 = smov 0   ;;  %s1282_s16 = smov 0  }
   0x6   :  { %s1284_s17 = smov 0   ;;  %s1286_s18 = smov 0  }
   0x7 LB: > { %s1301_s19 = sadd.s32 4294967295, %s1245_s18   ;;  %s895_s20 = sadd.s32 4294967294, %s1245_s18   ;;  %s1245_s18 = sphi %s1286_s18, %s1950_s18   ;;  %s1241_s17 = sphi %s1284_s17, %s1949_s17   ;;  %s1237_s16 = sphi %s1282_s16, %s1948_s16   ;;  %s1233_s15 = sphi %s1280_s15, %s1947_s15  }
   0x8   : > { %p42_p0 = scmp.ne.s32.totalorder %s1237_s16, %s1233_s15  ;;  %p43_p1 = scmp.eq.s32.totalorder %s1301_s19, 0 }
   0x9   : > { %p129_p2 = scmp.eq.s32.totalorder %s1301_s19, 1  ;;  %p135_p3 = scmp.eq.s32.totalorder %s895_s20, 1 }
   0xa   : > { %p1310_p4 = por %p43_p1, %p42_p0  ;;  %p896_p5 = scmp.ge.s32.totalorder %s1245_s18, 1 }
   0xb   : > { %p1315_p6 = por %p135_p3, %p42_p0  ;;  %p142_p7 = scmp.lt.s32.totalorder %s1245_s18, 3 }
   0xc   : > { %s153_s25 = sshll.u32 %s1936_s1, 4  ;;  %s1247_s27 = smov [#allocation5]   ;;  %s154_s25 = int_to_ptr.hbm [resolvable:$true] %s153_s25 }
   0xd   : > { %p1323_p8 = pnand %p896_p5, %p142_p7  ;;  %s155_s28 = sshll.u32 %s1247_s27, 4  ;;  %s156_s28 = int_to_ptr.vmem [resolvable:$true] %s155_s28 }
   0xe   : > { %s168_s6 = sshll.u32 %s1937_s2, 4  ;;  %s1248_s7 = smov 128   ;;  %s169_s6 = int_to_ptr.hbm [resolvable:$true] %s168_s6 }
   0xf   : > { %p981_p9 = pneg %p1323_p8  ;;  %s1249_s8 = smov 8  }
  0x10   : > { %s1250_s9 = smov [#allocation7]   ;;  %s179_s13 = sshll.u32 %s1938_s3, 4  ;;  %s180_s13 = int_to_ptr.hbm [resolvable:$true] %s179_s13 }
  0x11   : > { %p1331_p10 = pnand %p981_p9, %p43_p1  ;;  %s170_s10 = sshll.u32 %s1250_s9, 4  ;;  %s171_s10 = int_to_ptr.vmem [resolvable:$true] %s170_s10 }
  0x12   : > { %s1251_s14 = smov [#allocation8]   ;;  %s1350_s23 = sadd.s32 1, %s1245_s18  }
  0x13   : > { %984 = dma.hbm_to_vmem [thread:$0]  (!%p1331_p10), %s154_s25, 2048, %s156_s28, [#allocation6], %s1248_s7, %s1248_s7, %s1249_s8  }
  0x14   : > { %987 = dma.hbm_to_vmem [thread:$0]  (!%p1331_p10), %s169_s6, 128, %s171_s10, [#allocation6]  }
  0x15   : > { %s181_s20 = sshll.u32 %s1251_s14, 4  ;;  %s26_s24 = ssub.s32 %s1245_s18, %s1350_s23  ;;  %s182_s20 = int_to_ptr.vmem [resolvable:$true] %s181_s20 }
  0x16   : > { %990 = dma.hbm_to_vmem [thread:$0]  (!%p1331_p10), %s180_s13, 2048, %s182_s20, [#allocation9], %s1248_s7, %s1248_s7, %s1249_s8  }
  0x17   : > { %s29_s25 = sadd.s32 1, %s1241_s17  ;;  %p27_p12 = scmp.eq.s32.totalorder %s26_s24, 0 }
  0x18   : > { %p36_p13 = scmp.ne.s32.totalorder %s1241_s17, %s1237_s16  ;;  %p37_p0 = scmp.eq.s32.totalorder %s1245_s18, 0 }
  0x19   : > { %s1364_s27 = scalar_select %p27_p12, %s1241_s17, %s29_s25  }
  0x1a   : > { %p1368_p3 = por %p129_p2, %p36_p13  ;;  %p1002_p5 = scmp.lt.s32.totalorder %s1245_s18, 2 }
  0x1b   : > { %s195_s30 = sand.u32 1, %s1241_s17   ;;  %s915_s29 = sshll.u32 %s1245_s18, 8 }
  0x1c   : > { %p38_p7 = por %p37_p0, %p36_p13  ;;  %s901_s5 = sshll.u32 %s195_s30, 8 }
  0x1d   : > { %s204_s10 = scalar_lea.hbm %s1935_s0, %s915_s29  ;;  %s199_s12 = scalar_lea.vmem [#allocation2], %s901_s5 }
  0x1e   : > { %s205_s11 = sshll.u32 %s204_s10, 4  ;;  %s207_s13 = sshll.u32 %s199_s12, 4  ;;  %s206_s11 = int_to_ptr.hbm [resolvable:$true] %s205_s11  ;;  %s208_s13 = int_to_ptr.vmem [resolvable:$true] %s207_s13 }
  0x1f   : > { %p1378_p9 = pnand %p1002_p5, %p38_p7  ;;  %s196_s20 = scalar_lea.sflag [#allocation3], %s195_s30 }
  0x20   : > { %s1141_s24 = sshra.s32 %s206_s11, 4  ;;  %s1148_s5 = scalar_lea.hbm %s1935_s0, 512  ;;  %s1142_s24 = int_to_ptr.hbm [resolvable:$true] %s1141_s24 }
  0x21   : > { %s1143_s25 = scalar_lea.hbm %s1142_s24, 256  ;;  %p1145_p10 = pneg %p1378_p9 }
  0x22   : > { %p1144_p2 = scmp.ne.s32.totalorder %s1142_s24, %s1143_s25  ;;  %p1149_p0 = scmp.lt.s32.totalorder %s1142_s24, %s1935_s0 }
  0x23   : > { %p1150_p5 = scmp.lt.s32.totalorder %s1148_s5, %s1143_s25 }
  0x24   : > { %p1146_p12 = pnand %p1145_p10, %p1144_p2 }
  0x25   : > { %p1151_p7 = por %p1150_p5, %p1149_p0 }
  0x26   : > { %p1147_p13 = pneg %p1146_p12 }
  0x28   : > { %p1152_p11 = pnand %p1151_p7, %p1147_p13 }
  0x2a   : > { %1155 = shalt.err (!%p1152_p11)
}
  0x2b   : > { %994 = dma.hbm_to_vmem [thread:$0]  (!%p1378_p9), %s206_s11, 4096, %s208_s13, %s196_s20, %s1248_s7, %s1248_s7, %s1249_s8  }
  0x2c   : > { %219 = sbr.rel (%p1323_p8) target bundleno = 539 (0x21b), region = 36  ;;  %s1398_s30 = sand.u32 (!%p1323_p8), 1, %s1237_s16  }
  0x2d   : > { %s905_s12 = sshll.u32 (!%p1323_p8), %s1398_s30, 8  ;;  %s222_s24 = scalar_lea.sflag (!%p1323_p8), [#allocation3], %s1398_s30 }
  0x2e   : > { %s1404_s25 = scalar_lea.vmem (!%p1323_p8), [#allocation2], %s905_s12 }
  0x31   : > { %1216 = dma.done.wait (%p1310_p4), %s222_s24, 4096  }
  0x32   : > { %1218 = vsyncadd (%p1310_p4), %s222_s24, 4294963200 }
  0x33   : > { %1220 = dma.done.wait (%p43_p1), [#allocation6], 2176  }
  0x34   : > { %1222 = vsyncadd (%p43_p1), [#allocation6], 4294965120 }
  0x35   : > { %1224 = dma.done.wait (%p43_p1), [#allocation9], 2048  }
  0x36   : > { %1226 = vsyncadd (%p43_p1), [#allocation9], 4294965248  ;;  %v313_v0 = vld [vmem:[#allocation5 + $0x78] sm:$0xff]  ;;  %v312_v1 = vld [vmem:[#allocation5 + $0x70] sm:$0xff]  ;;  %s1764_s21 = scalar_lea.vmem [#allocation10], %s905_s12  ;;  %s916_s26 = sshll.u32 %s1301_s19, 8 }
  0x37   : > { %316 = vmatpush.msra.mxu0 %v313_v0  ;;  %917 = vmatpush.msra.mxu1 %v313_v0  ;;  %v311_v2 = vld [vmem:[#allocation5 + $0x68] sm:$0xff]  ;;  %v310_v3 = vld [vmem:[#allocation5 + $0x60] sm:$0xff]  ;;  %v309_v4 = vld [vmem:[#allocation5 + $0x58] sm:$0xff]  ;;  %s789_s8 = scalar_lea.hbm %s1939_s4, %s916_s26  ;;  %s790_s11 = sshll.u32 %s1764_s21, 4  ;;  %s791_s11 = int_to_ptr.vmem [resolvable:$true] %s790_s11 }
  0x38   : > { %919 = vmatpush.msra.mxu3 %v313_v0  ;;  %918 = vmatpush.msra.mxu2 %v313_v0  ;;  %v308_v5 = vld [vmem:[#allocation5 + $0x50] sm:$0xff]  ;;  %v307_v6 = vld [vmem:[#allocation5 + $0x48] sm:$0xff]  ;;  %v306_v7 = vld [vmem:[#allocation5 + $0x40] sm:$0xff]  ;;  %s792_s13 = sshll.u32 %s789_s8, 4  ;;  %s778_s14 = scalar_lea.sflag [#allocation4], %s1398_s30  ;;  %s793_s13 = int_to_ptr.hbm [resolvable:$true] %s792_s13 }
  0x39   : > { %317 = vmatpush.msra.mxu0 %v312_v1  ;;  %920 = vmatpush.msra.mxu1 %v312_v1  ;;  %v305_v8 = vld [vmem:[#allocation5 + $0x38] sm:$0xff]  ;;  %v304_v9 = vld [vmem:[#allocation5 + $0x30] sm:$0xff]  ;;  %v303_v10 = vld [vmem:[#allocation5 + $0x28] sm:$0xff]  ;;  %s1185_s20 = sshra.s32 %s793_s13, 4  ;;  %s1191_s9 = scalar_lea.hbm %s1939_s4, 512  ;;  %s1186_s20 = int_to_ptr.hbm [resolvable:$true] %s1185_s20 }
  0x3a   : > { %922 = vmatpush.msra.mxu3 %v312_v1  ;;  %921 = vmatpush.msra.mxu2 %v312_v1  ;;  %v302_v11 = vld [vmem:[#allocation5 + $0x20] sm:$0xff]  ;;  %v301_v12 = vld [vmem:[#allocation5 + $0x18] sm:$0xff]  ;;  %v300_v13 = vld [vmem:[#allocation5 + $0x10] sm:$0xff]  ;;  %s1187_s29 = scalar_lea.hbm %s1186_s20, 256  ;;  %p1192_p11 = scmp.lt.s32.totalorder %s1186_s20, %s1939_s4 }
  0x3b   : > { %318 = vmatpush.msra.mxu0 %v311_v2  ;;  %923 = vmatpush.msra.mxu1 %v311_v2  ;;  %v299_v14 = vld [vmem:[#allocation5 + $0x8] sm:$0xff]  ;;  %v298_v15 = vld [vmem:[#allocation5] sm:$0xff]  ;;  %v276_v19 = vld [vmem:[%s1404_s25 + $0x50] sm:$0xff]  ;;  %p1188_p1 = scmp.ne.s32.totalorder %s1186_s20, %s1187_s29  ;;  %p1193_p9 = scmp.lt.s32.totalorder %s1191_s9, %s1187_s29 }
  0x3c   : > { %925 = vmatpush.msra.mxu3 %v311_v2  ;;  %924 = vmatpush.msra.mxu2 %v311_v2  ;;  %v266_v16 = vld [vmem:[%s1404_s25] sm:$0xff]  ;;  %v275_v17 = vld [vmem:[%s1404_s25 + $0x48] sm:$0xff]  ;;  %v289_v20 = vld [vmem:[%s1404_s25 + $0xb8] sm:$0xff] }
  0x3d   : > { %319 = vmatpush.msra.mxu0 %v310_v3  ;;  %926 = vmatpush.msra.mxu1 %v310_v3  ;;  %v267_v18 = vld [vmem:[%s1404_s25 + $0x8] sm:$0xff]  ;;  %v268_v22 = vld [vmem:[%s1404_s25 + $0x10] sm:$0xff]  ;;  %v277_v23 = vld [vmem:[%s1404_s25 + $0x58] sm:$0xff]  ;;  %p1189_p4 = pnand %p1188_p1, %p1368_p3  ;;  %p1194_p2 = por %p1193_p9, %p1192_p11 }
  0x3e   : > { %928 = vmatpush.msra.mxu3 %v310_v3  ;;  %927 = vmatpush.msra.mxu2 %v310_v3  ;;  %v283_v21 = vld [vmem:[%s1404_s25 + $0x88] sm:$0xff]  ;;  %v290_v24 = vld [vmem:[%s1404_s25 + $0xc0] sm:$0xff]  ;;  %v284_v25 = vld [vmem:[%s1404_s25 + $0x90] sm:$0xff] }
  0x3f   : > { %320 = vmatpush.msra.mxu0 %v309_v4  ;;  %929 = vmatpush.msra.mxu1 %v309_v4  ;;  %v269_v26 = vld [vmem:[%s1404_s25 + $0x18] sm:$0xff]  ;;  %v278_v27 = vld [vmem:[%s1404_s25 + $0x60] sm:$0xff]  ;;  %v291_v28 = vld [vmem:[%s1404_s25 + $0xc8] sm:$0xff]  ;;  %p1190_p8 = pneg %p1189_p4 }
  0x40   : > { %931 = vmatpush.msra.mxu3 %v309_v4  ;;  %930 = vmatpush.msra.mxu2 %v309_v4  ;;  %v285_v29 = vld [vmem:[%s1404_s25 + $0x98] sm:$0xff]  ;;  %v270_v30 = vld [vmem:[%s1404_s25 + $0x20] sm:$0xff]  ;;  %v279_v31 = vld [vmem:[%s1404_s25 + $0x68] sm:$0xff] }
  0x41   : > { %321 = vmatpush.msra.mxu0 %v308_v5  ;;  %932 = vmatpush.msra.mxu1 %v308_v5  ;;  %v292_v32 = vld [vmem:[%s1404_s25 + $0xd0] sm:$0xff]  ;;  %v286_v33 = vld [vmem:[%s1404_s25 + $0xa0] sm:$0xff]  ;;  %v271_v34 = vld [vmem:[%s1404_s25 + $0x28] sm:$0xff]  ;;  %p1195_p10 = pnand %p1194_p2, %p1190_p8 }
  0x42   : > { %934 = vmatpush.msra.mxu3 %v308_v5  ;;  %933 = vmatpush.msra.mxu2 %v308_v5  ;;  %v280_v35 = vld [vmem:[%s1404_s25 + $0x70] sm:$0xff]  ;;  %v293_v36 = vld [vmem:[%s1404_s25 + $0xd8] sm:$0xff]  ;;  %v287_v37 = vld [vmem:[%s1404_s25 + $0xa8] sm:$0xff] }
  0x43   : > { %322 = vmatpush.msra.mxu0 %v307_v6  ;;  %935 = vmatpush.msra.mxu1 %v307_v6  ;;  %v272_v38 = vld [vmem:[%s1404_s25 + $0x30] sm:$0xff]  ;;  %v281_v39 = vld [vmem:[%s1404_s25 + $0x78] sm:$0xff]  ;;  %v294_v40 = vld [vmem:[%s1404_s25 + $0xe0] sm:$0xff] }
  0x44   : > { %937 = vmatpush.msra.mxu3 %v307_v6  ;;  %936 = vmatpush.msra.mxu2 %v307_v6  ;;  %v288_v41 = vld [vmem:[%s1404_s25 + $0xb0] sm:$0xff]  ;;  %v273_v42 = vld [vmem:[%s1404_s25 + $0x38] sm:$0xff]  ;;  %v282_v43 = vld [vmem:[%s1404_s25 + $0x80] sm:$0xff] }
  0x45   : > { %323 = vmatpush.msra.mxu0 %v306_v7  ;;  %938 = vmatpush.msra.mxu1 %v306_v7  ;;  %v295_v44 = vld [vmem:[%s1404_s25 + $0xe8] sm:$0xff]  ;;  %v274_v45 = vld [vmem:[%s1404_s25 + $0x40] sm:$0xff]  ;;  %v296_v46 = vld [vmem:[%s1404_s25 + $0xf0] sm:$0xff] }
  0x46   : > { %940 = vmatpush.msra.mxu3 %v306_v7  ;;  %939 = vmatpush.msra.mxu2 %v306_v7  ;;  %v297_v47 = vld [vmem:[%s1404_s25 + $0xf8] sm:$0xff]  ;;  %v1464_v61 = vld [vmem:[#allocation7] sm:$0xff] }
  0x47   : > { %324 = vmatpush.msra.mxu0 %v305_v8  ;;  %941 = vmatpush.msra.mxu1 %v305_v8  ;;  %v1471_v0 = vperm.slane %v1464_v61, 0  ;;  %v559_v6 = vld [vmem:[#allocation8 + $0x78] sm:$0xff] }
  0x48   : > { %943 = vmatpush.msra.mxu3 %v305_v8  ;;  %942 = vmatpush.msra.mxu2 %v305_v8 }
  0x49   : > { %325 = vmatpush.msra.mxu0 %v304_v9  ;;  %944 = vmatpush.msra.mxu1 %v304_v9 }
  0x4a   : > { %946 = vmatpush.msra.mxu3 %v304_v9  ;;  %945 = vmatpush.msra.mxu2 %v304_v9  ;;  %v558_v9 = vld [vmem:[#allocation8 + $0x70] sm:$0xff] }
  0x4b   : > { %326 = vmatpush.msra.mxu0 %v303_v10  ;;  %947 = vmatpush.msra.mxu1 %v303_v10 }
  0x4c   : > { %949 = vmatpush.msra.mxu3 %v303_v10  ;;  %948 = vmatpush.msra.mxu2 %v303_v10  ;;  %v557_v10 = vld [vmem:[#allocation8 + $0x68] sm:$0xff] }
  0x4d   : > { %327 = vmatpush.msra.mxu0 %v302_v11  ;;  %950 = vmatpush.msra.mxu1 %v302_v11 }
  0x4e   : > { %952 = vmatpush.msra.mxu3 %v302_v11  ;;  %951 = vmatpush.msra.mxu2 %v302_v11 }
  0x4f   : > { %328 = vmatpush.msra.mxu0 %v301_v12  ;;  %953 = vmatpush.msra.mxu1 %v301_v12 }
  0x50   : > { %955 = vmatpush.msra.mxu3 %v301_v12  ;;  %954 = vmatpush.msra.mxu2 %v301_v12 }
  0x51   : > { %329 = vmatpush.msra.mxu0 %v300_v13  ;;  %956 = vmatpush.msra.mxu1 %v300_v13 }
  0x52   : > { %958 = vmatpush.msra.mxu3 %v300_v13  ;;  %957 = vmatpush.msra.mxu2 %v300_v13 }
  0x53   : > { %330 = vmatpush.msra.mxu0 %v299_v14  ;;  %959 = vmatpush.msra.mxu1 %v299_v14 }
  0x54   : > { %961 = vmatpush.msra.mxu3 %v299_v14  ;;  %960 = vmatpush.msra.mxu2 %v299_v14 }
  0x55   : > { %331 = vmatpush.msra.mxu0 %v298_v15  ;;  %962 = vmatpush.msra.mxu1 %v298_v15 }
  0x56   : > { %332 = vmatmul.f32.vlgmr.msra.gmra.mxu0 %v266_v16  ;;  %359 = vmatmul.f32.vlgmr.msra.gmra.mxu1 %v275_v17 }
  0x57   : > { %964 = vmatpush.msra.mxu3 %v298_v15  ;;  %963 = vmatpush.msra.mxu2 %v298_v15 }
  0x58   : > { %401 = vmatmul.f32.vlgmr.msra.gmra.mxu3 %v289_v20  ;;  %383 = vmatmul.f32.vlgmr.msra.gmra.mxu2 %v283_v21 }
  0x59   : > { %560 = vmatpush.msrb.mxu1 %v559_v6  ;;  %580 = vmatpush.msrb.mxu2 %v559_v6 }
  0x5b   : > { %561 = vmatpush.msrb.mxu1 %v558_v9  ;;  %581 = vmatpush.msrb.mxu2 %v558_v9 }
  0x5d   : > { %562 = vmatpush.msrb.mxu1 %v557_v10  ;;  %582 = vmatpush.msrb.mxu2 %v557_v10 }
  0x5e   : > { %335 = vmatmul.f32.gmra.mxu0 %v267_v18  ;;  %362 = vmatmul.f32.gmra.mxu1 %v276_v19 }
  0x60   : > { %404 = vmatmul.f32.gmra.mxu3 %v290_v24  ;;  %386 = vmatmul.f32.gmra.mxu2 %v284_v25 }
  0x66   : > { %338 = vmatmul.f32.gmra.mxu0 %v268_v22  ;;  %365 = vmatmul.f32.gmra.mxu1 %v277_v23 }
  0x68   : > { %407 = vmatmul.f32.gmra.mxu3 %v291_v28  ;;  %389 = vmatmul.f32.gmra.mxu2 %v285_v29 }
  0x6e   : > { %341 = vmatmul.f32.gmra.mxu0 %v269_v26  ;;  %368 = vmatmul.f32.gmra.mxu1 %v278_v27  ;;  %v556_v27 = vld [vmem:[#allocation8 + $0x60] sm:$0xff] }
  0x6f   : > { %563 = vmatpush.msrb.mxu1 %v556_v27  ;;  %583 = vmatpush.msrb.mxu2 %v556_v27 }
  0x70   : > { %410 = vmatmul.f32.gmra.mxu3 %v292_v32  ;;  %392 = vmatmul.f32.gmra.mxu2 %v286_v33 }
  0x76   : > { %344 = vmatmul.f32.gmra.mxu0 %v270_v30  ;;  %371 = vmatmul.f32.gmra.mxu1 %v279_v31 }
  0x78   : > { %413 = vmatmul.f32.gmra.mxu3 %v293_v36  ;;  %395 = vmatmul.f32.gmra.mxu2 %v287_v37 }
  0x7e   : > { %347 = vmatmul.f32.gmra.mxu0 %v271_v34  ;;  %374 = vmatmul.f32.gmra.mxu1 %v280_v35 }
  0x80   : > { %416 = vmatmul.f32.gmra.mxu3 %v294_v40  ;;  %398 = vmatmul.f32.gmra.mxu2 %v288_v41  ;;  %v554_v40 = vld [vmem:[#allocation8 + $0x50] sm:$0xff] }
  0x86   : > { %350 = vmatmul.f32.gmra.mxu0 %v272_v38  ;;  %377 = vmatmul.f32.gmra.mxu1 %v281_v39  ;;  %v555_v39 = vld [vmem:[#allocation8 + $0x58] sm:$0xff] }
  0x87   : > { %564 = vmatpush.msrb.mxu1 %v555_v39  ;;  %584 = vmatpush.msrb.mxu2 %v555_v39 }
  0x88   : > { %419 = vmatmul.f32.gmra.mxu3 %v295_v44 }
  0x89   : > { %565 = vmatpush.msrb.mxu1 %v554_v40  ;;  %585 = vmatpush.msrb.mxu2 %v554_v40  ;;  %v551_v40 = vld [vmem:[#allocation8 + $0x38] sm:$0xff] }
  0x8e   : > { %353 = vmatmul.f32.gmra.mxu0 %v273_v42  ;;  %380 = vmatmul.f32.gmra.mxu1 %v282_v43 }
  0x90   : > { %422 = vmatmul.f32.gmra.mxu3 %v296_v46 }
  0x96   : > { %356 = vmatmul.f32.gmra.mxu0 %v274_v45 }
  0x98   : > { %425 = vmatmul.f32.gmra.mxu3 %v297_v47 }
  0xd3   : > { %v333_v48 = vpop.f32.mrf.mxu0  ;;  %v1450_v49 = vpop.f32.mrf.mxu1 }
  0xd4   : > { %v1479_v4 = vadd.f32 %v333_v48, %v1471_v0  ;;  %v1530_v43 = vadd.f32 %v1450_v49, %v1471_v0 }
  0xd6   : > { %v474_v11 = vmul.f32 %v1479_v4, %v1479_v4 }
  0xdb   : > { %v336_v50 = vpop.f32.mrf.mxu0  ;;  %v1452_v51 = vpop.f32.mrf.mxu1 }
  0xdc   : > { %v1454_v53 = vpop.f32.mrf.mxu3  ;;  %v1462_v59 = vpop.f32.mrf.mxu2  ;;  %v1476_v2 = vadd.f32 %v336_v50, %v1471_v0  ;;  %v1540_v48 = vadd.f32 %v1452_v51, %v1471_v0 }
  0xde   : > { %v475_v7 = vmul.f32 %v1476_v2, %v1476_v2  ;;  %v429_v12 = vadd.f32 %v1476_v2, %v1479_v4  ;;  %v484_v51 = vmul.f32 %v1540_v48, %v1540_v48 }
  0xe0   : > { %v506_v17 = vadd.f32 %v475_v7, %v474_v11 }
  0xe3   : > { %v339_v52 = vpop.f32.mrf.mxu0  ;;  %v1456_v55 = vpop.f32.mrf.mxu1 }
  0xe4   : > { %v1458_v57 = vpop.f32.mrf.mxu3  ;;  %v1473_v1 = vpop.f32.mrf.mxu2  ;;  %v1482_v5 = vadd.f32 %v339_v52, %v1471_v0 }
  0xe6   : > { %v476_v13 = vmul.f32 %v1482_v5, %v1482_v5  ;;  %v430_v18 = vadd.f32 %v429_v12, %v1482_v5 }
  0xe8   : > { %v507_v23 = vadd.f32 %v506_v17, %v476_v13 }
  0xeb   : > { %v342_v54 = vpop.f32.mrf.mxu0  ;;  %v1460_v58 = vpop.f32.mrf.mxu1 }
  0xec   : > { %v1466_v62 = vpop.f32.mrf.mxu3  ;;  %v1487_v8 = vadd.f32 %v342_v54, %v1471_v0  ;;  %v1506_v22 = vpop.f32.mrf.mxu2  ;;  %v483_v54 = vmul.f32 %v1530_v43, %v1530_v43  ;;  %v1556_v6 = vadd.f32 %v1460_v58, %v1471_v0 }
  0xee   : > { %v477_v19 = vmul.f32 %v1487_v8, %v1487_v8  ;;  %v431_v24 = vadd.f32 %v430_v18, %v1487_v8  ;;  %v486_v58 = vmul.f32 %v1556_v6, %v1556_v6 }
  0xf0   : > { %v508_v28 = vadd.f32 %v507_v23, %v477_v19 }
  0xf3   : > { %v345_v56 = vpop.f32.mrf.mxu0  ;;  %v1468_v63 = vpop.f32.mrf.mxu1 }
  0xf4   : > { %v1496_v14 = vadd.f32 %v345_v56, %v1471_v0  ;;  %v1498_v15 = vpop.f32.mrf.mxu3  ;;  %v1536_v47 = vpop.f32.mrf.mxu2  ;;  %v1549_v56 = vadd.f32 %v1456_v55, %v1471_v0  ;;  %v1561_v10 = vadd.f32 %v1468_v63, %v1471_v0 }
  0xf6   : > { %v478_v25 = vmul.f32 %v1496_v14, %v1496_v14  ;;  %v432_v29 = vadd.f32 %v431_v24, %v1496_v14  ;;  %v485_v55 = vmul.f32 %v1549_v56, %v1549_v56  ;;  %v487_v63 = vmul.f32 %v1561_v10, %v1561_v10 }
  0xf8   : > { %v509_v32 = vadd.f32 %v508_v28, %v478_v25 }
  0xfb   : > { %v348_v60 = vpop.f32.mrf.mxu0  ;;  %v375_v16 = vpop.f32.mrf.mxu1 }
  0xfc   : > { %v1504_v20 = vadd.f32 %v348_v60, %v1471_v0  ;;  %v1526_v38 = vpop.f32.mrf.mxu3  ;;  %v1571_v18 = vadd.f32 %v375_v16, %v1471_v0  ;;  %v396_v23 = vpop.f32.mrf.mxu2 }
  0xfe   : > { %v479_v30 = vmul.f32 %v1504_v20, %v1504_v20  ;;  %v433_v33 = vadd.f32 %v432_v29, %v1504_v20  ;;  %v553_v29 = vld [vmem:[#allocation8 + $0x48] sm:$0xff] }
  0xff   : > { %566 = vmatpush.msrb.mxu1 %v553_v29  ;;  %586 = vmatpush.msrb.mxu2 %v553_v29  ;;  %v1630_v29 = vadd.f32 %v1454_v53, %v1471_v0 }
 0x100   : > { %v510_v35 = vadd.f32 %v509_v32, %v479_v30  ;;  %v488_v30 = vmul.f32 %v1571_v18, %v1571_v18 }
 0x103   : > { %v351_v3 = vpop.f32.mrf.mxu0  ;;  %v378_v42 = vpop.f32.mrf.mxu1 }
 0x104   : > { %v1512_v26 = vadd.f32 %v351_v3, %v1471_v0  ;;  %v1566_v17 = vpop.f32.mrf.mxu3  ;;  %v1578_v27 = vadd.f32 %v378_v42, %v1471_v0  ;;  %v1597_v42 = vadd.f32 %v1473_v1, %v1471_v0  ;;  %v399_v1 = vpop.f32.mrf.mxu2 }
 0x106   : > { %v480_v34 = vmul.f32 %v1512_v26, %v1512_v26  ;;  %v434_v36 = vadd.f32 %v433_v33, %v1512_v26  ;;  %v552_v33 = vld [vmem:[#allocation8 + $0x40] sm:$0xff] }
 0x107   : > { %567 = vmatpush.msrb.mxu1 %v552_v33  ;;  %587 = vmatpush.msrb.mxu2 %v552_v33  ;;  %v544_v33 = vld [vmem:[#allocation8] sm:$0xff] }
 0x108   : > { %v511_v44 = vadd.f32 %v510_v35, %v480_v34  ;;  %v1588_v34 = vadd.f32 %v1462_v59, %v1471_v0 }
 0x109   : > { %568 = vmatpush.msrb.mxu1 %v551_v40  ;;  %588 = vmatpush.msrb.mxu2 %v551_v40  ;;  %v1646_v40 = vadd.f32 %v1466_v62, %v1471_v0  ;;  %v1660_v62 = vadd.f32 %v1526_v38, %v1471_v0 }
 0x10b   : > { %v354_v21 = vpop.f32.mrf.mxu0  ;;  %v381_v13 = vpop.f32.mrf.mxu1 }
 0x10c   : > { %v1518_v31 = vadd.f32 %v354_v21, %v1471_v0  ;;  %v1581_v28 = vadd.f32 %v381_v13, %v1471_v0  ;;  %v1619_v13 = vadd.f32 %v396_v23, %v1471_v0 }
 0x10e   : > { %v481_v37 = vmul.f32 %v1518_v31, %v1518_v31  ;;  %v435_v45 = vadd.f32 %v434_v36, %v1518_v31  ;;  %v490_v39 = vmul.f32 %v1581_v28, %v1581_v28 }
 0x110   : > { %v512_v50 = vadd.f32 %v511_v44, %v481_v37  ;;  %v489_v37 = vmul.f32 %v1578_v27, %v1578_v27 }
 0x113   : > { %v357_v41 = vpop.f32.mrf.mxu0 }
 0x114   : > { %v1534_v46 = vadd.f32 %v357_v41, %v1471_v0  ;;  %v550_v41 = vld [vmem:[#allocation8 + $0x30] sm:$0xff] }
 0x115   : > { %569 = vmatpush.msrb.mxu1 %v550_v41  ;;  %589 = vmatpush.msrb.mxu2 %v550_v41 }
 0x116   : > { %v436_v52 = vadd.f32 %v435_v45, %v1534_v46  ;;  %v482_v49 = vmul.f32 %v1534_v46, %v1534_v46  ;;  %v1602_v45 = vadd.f32 %v1506_v22, %v1471_v0  ;;  %v1613_v22 = vadd.f32 %v1536_v47, %v1471_v0  ;;  %v546_v47 = vld [vmem:[#allocation8 + $0x10] sm:$0xff] }
 0x118   : > { %v437_v60 = vadd.f32 %v436_v52, %v1530_v43  ;;  %v513_v3 = vadd.f32 %v512_v50, %v482_v49  ;;  %v1604_v50 = vpop.f32.mrf.mxu3  ;;  %v491_v52 = vmul.f32 %v1588_v34, %v1588_v34 }
 0x119   : > { %v1674_v38 = vadd.f32 %v1604_v50, %v1471_v0 }
 0x11a   : > { %v438_v7 = vadd.f32 %v437_v60, %v1540_v48  ;;  %v514_v9 = vadd.f32 %v513_v3, %v483_v54  ;;  %v549_v60 = vld [vmem:[#allocation8 + $0x28] sm:$0xff]  ;;  %v492_v3 = vmul.f32 %v1597_v42, %v1597_v42 }
 0x11b   : > { %570 = vmatpush.msrb.mxu1 %v549_v60  ;;  %590 = vmatpush.msrb.mxu2 %v549_v60  ;;  %v499_v60 = vmul.f32 %v1646_v40, %v1646_v40  ;;  %v503_v50 = vmul.f32 %v1674_v38, %v1674_v38 }
 0x11c   : > { %v515_v11 = vadd.f32 %v514_v9, %v484_v51  ;;  %v439_v12 = vadd.f32 %v438_v7, %v1549_v56  ;;  %v548_v9 = vld [vmem:[#allocation8 + $0x20] sm:$0xff] }
 0x11d   : > { %571 = vmatpush.msrb.mxu1 %v548_v9  ;;  %591 = vmatpush.msrb.mxu2 %v548_v9 }
 0x11e   : > { %v440_v19 = vadd.f32 %v439_v12, %v1556_v6  ;;  %v516_v21 = vadd.f32 %v515_v11, %v485_v55  ;;  %v547_v55 = vld [vmem:[#allocation8 + $0x18] sm:$0xff]  ;;  %v493_v11 = vmul.f32 %v1602_v45, %v1602_v45 }
 0x11f   : > { %572 = vmatpush.msrb.mxu1 %v547_v55  ;;  %592 = vmatpush.msrb.mxu2 %v547_v55 }
 0x120   : > { %v441_v24 = vadd.f32 %v440_v19, %v1561_v10  ;;  %v517_v25 = vadd.f32 %v516_v21, %v486_v58  ;;  %v1623_v19 = vadd.f32 %v399_v1, %v1471_v0  ;;  %v494_v21 = vmul.f32 %v1613_v22, %v1613_v22 }
 0x121   : > { %593 = vmatpush.msrb.mxu2 %v546_v47  ;;  %573 = vmatpush.msrb.mxu1 %v546_v47 }
 0x122   : > { %v442_v16 = vadd.f32 %v441_v24, %v1571_v18  ;;  %v518_v32 = vadd.f32 %v517_v25, %v487_v63  ;;  %v545_v25 = vld [vmem:[#allocation8 + $0x8] sm:$0xff] }
 0x123   : > { %594 = vmatpush.msrb.mxu2 %v545_v25  ;;  %574 = vmatpush.msrb.mxu1 %v545_v25 }
 0x124   : > { %v519_v35 = vadd.f32 %v518_v32, %v488_v30  ;;  %v443_v36 = vadd.f32 %v442_v16, %v1578_v27  ;;  %v495_v16 = vmul.f32 %v1619_v13, %v1619_v13  ;;  %v496_v32 = vmul.f32 %v1623_v19, %v1623_v19 }
 0x125   : > { %575 = vmatpush.msrb.mxu1 %v544_v33  ;;  %595 = vmatpush.msrb.mxu2 %v544_v33 }
 0x126   : > { %v520_v59 = vadd.f32 %v519_v35, %v489_v37  ;;  %v444_v44 = vadd.f32 %v443_v36, %v1581_v28  ;;  %v1639_v35 = vadd.f32 %v1458_v57, %v1471_v0  ;;  %v423_v36 = vpop.f32.mrf.mxu3 }
 0x128   : > { %v445_v49 = vadd.f32 %v444_v44, %v1588_v34  ;;  %v521_v54 = vadd.f32 %v520_v59, %v490_v39  ;;  %v497_v39 = vmul.f32 %v1630_v29, %v1630_v29  ;;  %v498_v57 = vmul.f32 %v1639_v35, %v1639_v35 }
 0x129   : > { %v1653_v44 = vadd.f32 %v1498_v15, %v1471_v0 }
 0x12a   : > { %v446_v51 = vadd.f32 %v445_v49, %v1597_v42  ;;  %v522_v7 = vadd.f32 %v521_v54, %v491_v52  ;;  %v1252_v54 = vmov 256.0  }
 0x12b   : > { %1047 = vrcp.f32 %v1252_v54  ;;  %v500_v15 = vmul.f32 %v1653_v44, %v1653_v44 }
 0x12c   : > { %v523_v12 = vadd.f32 %v522_v7, %v492_v3  ;;  %v447_v58 = vadd.f32 %v446_v51, %v1602_v45  ;;  %v1665_v51 = vadd.f32 %v1566_v17, %v1471_v0 }
 0x12e   : > { %v448_v63 = vadd.f32 %v447_v58, %v1613_v22  ;;  %v524_v24 = vadd.f32 %v523_v12, %v493_v11  ;;  %v426_v55 = vpop.f32.mrf.mxu3  ;;  %v501_v12 = vmul.f32 %v1660_v62, %v1660_v62  ;;  %v502_v17 = vmul.f32 %v1665_v51, %v1665_v51 }
 0x12f   : > { %v1684_v25 = vadd.f32 %v426_v55, %v1471_v0 }
 0x130   : > { %v449_v23 = vadd.f32 %v448_v63, %v1619_v13  ;;  %v525_v30 = vadd.f32 %v524_v24, %v494_v21  ;;  %v1681_v24 = vadd.f32 %v423_v36, %v1471_v0 }
 0x131   : > { %v1048_v11 = vpop.eup %1047  ;;  %v505_v36 = vmul.f32 %v1684_v25, %v1684_v25 }
 0x132   : > { %v526_v53 = vadd.f32 %v525_v30, %v495_v16  ;;  %v450_v37 = vadd.f32 %v449_v23, %v1623_v19  ;;  %v467_v23 = vmul.f32 256.0, %v1048_v11  ;;  %vm471_vm0 = vweird.f32 %v1048_v11 }
 0x134   : > { %v451_v41 = vadd.f32 %v450_v37, %v1630_v29  ;;  %v527_v59 = vadd.f32 %v526_v53, %v496_v32  ;;  %v504_v53 = vmul.f32 %v1681_v24, %v1681_v24  ;;  %v468_v37 = vsub.f32 1.0, %v467_v23 }
 0x136   : > { %v452_v52 = vadd.f32 %v451_v41, %v1639_v35  ;;  %v528_v49 = vadd.f32 %v527_v59, %v497_v39 }
 0x138   : > { %v453_v1 = vadd.f32 %v452_v52, %v1646_v40  ;;  %v529_v3 = vadd.f32 %v528_v49, %v498_v57  ;;  %v469_v57 = vmul.f32 %v1048_v11, %v468_v37 }
 0x13a   : > { %v530_v7 = vadd.f32 %v529_v3, %v499_v60  ;;  %v454_v9 = vadd.f32 %v453_v1, %v1653_v44  ;;  %v470_v1 = vadd.f32 %v1048_v11, %v469_v57 }
 0x13c   : > { %v455_v58 = vadd.f32 %v454_v9, %v1660_v62  ;;  %v531_v47 = vadd.f32 %v530_v7, %v500_v15  ;;  %v472_v55 = vsel %vm471_vm0, %v1048_v11, %v470_v1 }
 0x13e   : > { %v456_v21 = vadd.f32 %v455_v58, %v1665_v51  ;;  %v532_v63 = vadd.f32 %v531_v47, %v501_v12 }
 0x140   : > { %v457_v16 = vadd.f32 %v456_v21, %v1674_v38  ;;  %v533_v30 = vadd.f32 %v532_v63, %v502_v17 }
 0x142   : > { %v534_v32 = vadd.f32 %v533_v30, %v503_v50  ;;  %v458_v33 = vadd.f32 %v457_v16, %v1681_v24 }
 0x144   : > { %v535_v39 = vadd.f32 %v534_v32, %v504_v53  ;;  %v459_v0 = vadd.f32 %v458_v33, %v1684_v25 }
 0x146   : > { %v460_v41 = vrot.slane %v459_v0, 4  ;;  %v536_v59 = vadd.f32 %v535_v39, %v505_v36 }
 0x148   : > { %v461_v52 = vadd.f32 %v460_v41, %v459_v0  ;;  %v537_v49 = vrot.slane %v536_v59, 4 }
 0x14a   : > { %v462_v54 = vrot.slane %v461_v52, 2  ;;  %v538_v60 = vadd.f32 %v537_v49, %v536_v59  ;;  %v1706_v49 = vperm.slane %v1464_v61, 1 }
 0x14c   : > { %v463_v3 = vadd.f32 %v462_v54, %v461_v52  ;;  %v539_v15 = vrot.slane %v538_v60, 2 }
 0x14e   : > { %v464_v7 = vrot.slane %v463_v3, 1  ;;  %v540_v9 = vadd.f32 %v539_v15, %v538_v60 }
 0x150   : > { %v465_v12 = vadd.f32 %v464_v7, %v463_v3  ;;  %v541_v58 = vrot.slane %v540_v9, 1 }
 0x152   : > { %v473_v47 = vmul.f32 %v472_v55, %v465_v12  ;;  %v542_v17 = vadd.f32 %v541_v58, %v540_v9 }
 0x154   : > { %576 = vmatmul.f32.vlgmr.msrb.gmra.mxu1 %v473_v47  ;;  %v543_v21 = vmul.f32 %v542_v17, %v472_v55 }
 0x156   : > { %596 = vmatmul.f32.vlgmr.msrb.gmra.mxu2 %v543_v21 }
 0x1d1   : > { %v577_v63 = vpop.f32.mrf.mxu1 }
 0x1d2   : > { %v600_v16 = vmul.f32 %v577_v63, %v577_v63  ;;  %v1695_v0 = vperm.slane %v577_v63, 0 }
 0x1d4   : > { %v614_v59 = vsub.f32 %v1479_v4, %v1695_v0  ;;  %v615_v57 = vsub.f32 %v1476_v2, %v1695_v0  ;;  %v616_v52 = vsub.f32 %v1482_v5, %v1695_v0  ;;  %v617_v54 = vsub.f32 %v1487_v8, %v1695_v0 }
 0x1d5   : > { %v618_v60 = vsub.f32 %v1496_v14, %v1695_v0  ;;  %v619_v2 = vsub.f32 %v1504_v20, %v1695_v0  ;;  %v620_v15 = vsub.f32 %v1512_v26, %v1695_v0  ;;  %v1722_v8 = vperm.slane %v1464_v61, 2 }
 0x1d6   : > { %v621_v14 = vsub.f32 %v1518_v31, %v1695_v0  ;;  %v622_v9 = vsub.f32 %v1534_v46, %v1695_v0  ;;  %v623_v61 = vsub.f32 %v1530_v43, %v1695_v0  ;;  %v624_v47 = vsub.f32 %v1540_v48, %v1695_v0 }
 0x1d7   : > { %v625_v17 = vsub.f32 %v1549_v56, %v1695_v0 }
 0x1d9   : > { %v597_v23 = vpop.f32.mrf.mxu2 }
 0x1da   : > { %v601_v50 = vsub.f32 %v597_v23, %v600_v16  ;;  %v626_v23 = vsub.f32 %v1556_v6, %v1695_v0 }
 0x1dc   : > { %v602_v30 = vadd.f32 1e-05, %v601_v50 }
 0x1de   : > { %1049 = vrsqrt.f32 %v602_v30  ;;  %vm609_vm2 = vweird.f32 %v602_v30 }
 0x1e4   : > { %v1050_v32 = vpop.eup %1049 }
 0x1e5   : > { %v604_v33 = vmul.f32 %v1050_v32, %v602_v30  ;;  %vm610_vm1 = vweird.f32 %v1050_v32 }
 0x1e6   : > { %vm611_vm3 = vmor %vm609_vm2, %vm610_vm1 }
 0x1e7   : > { %v605_v53 = vmul.f32 %v1050_v32, %v604_v33  ;;  %v627_v33 = vsub.f32 %v1561_v10, %v1695_v0  ;;  %v629_v10 = vsub.f32 %v1578_v27, %v1695_v0  ;;  %v631_v27 = vsub.f32 %v1588_v34, %v1695_v0 }
 0x1e8   : > { %v633_v34 = vsub.f32 %v1602_v45, %v1695_v0  ;;  %v635_v45 = vsub.f32 %v1619_v13, %v1695_v0  ;;  %v637_v13 = vsub.f32 %v1630_v29, %v1695_v0  ;;  %v639_v29 = vsub.f32 %v1646_v40, %v1695_v0 }
 0x1e9   : > { %v606_v36 = vmul.f32 0.5, %v605_v53  ;;  %v641_v40 = vsub.f32 %v1660_v62, %v1695_v0  ;;  %v643_v62 = vsub.f32 %v1674_v38, %v1695_v0  ;;  %v645_v38 = vsub.f32 %v1684_v25, %v1695_v0 }
 0x1eb   : > { %v607_v37 = vsub.f32 1.5, %v606_v36 }
 0x1ed   : > { %v608_v39 = vmul.f32 %v1050_v32, %v607_v37  ;;  %v628_v37 = vsub.f32 %v1571_v18, %v1695_v0 }
 0x1ef   : > { %v612_v11 = vsel %vm611_vm3, %v1050_v32, %v608_v39 }
 0x1f0   : > { %v1697_v41 = vperm.slane %v612_v11, 0 }
 0x1f2   : > { %v647_v1 = vmul.f32 %v1697_v41, %v614_v59  ;;  %v648_v3 = vmul.f32 %v1697_v41, %v615_v57  ;;  %v649_v4 = vmul.f32 %v1697_v41, %v616_v52  ;;  %v650_v5 = vmul.f32 %v1697_v41, %v617_v54 }
 0x1f3   : > { %v651_v7 = vmul.f32 %v1697_v41, %v618_v60  ;;  %v652_v55 = vmul.f32 %v1697_v41, %v619_v2  ;;  %v653_v20 = vmul.f32 %v1697_v41, %v620_v15  ;;  %v654_v31 = vmul.f32 %v1697_v41, %v621_v14 }
 0x1f4   : > { %v680_v12 = vmul.f32 %v1706_v49, %v647_v1  ;;  %v681_v58 = vmul.f32 %v1706_v49, %v648_v3  ;;  %v682_v26 = vmul.f32 %v1706_v49, %v649_v4  ;;  %v683_v46 = vmul.f32 %v1706_v49, %v650_v5 }
 0x1f5   : > { %v655_v21 = vmul.f32 %v1697_v41, %v622_v9  ;;  %v684_v63 = vmul.f32 %v1706_v49, %v651_v7  ;;  %v656_v43 = vmul.f32 %v1697_v41, %v623_v61  ;;  %v657_v16 = vmul.f32 %v1697_v41, %v624_v47 }
 0x1f6   : > { %v685_v48 = vmul.f32 %v1706_v49, %v652_v55  ;;  %v686_v50 = vmul.f32 %v1706_v49, %v653_v20  ;;  %v713_v30 = vadd.f32 %v1722_v8, %v680_v12  ;;  %v714_v56 = vadd.f32 %v1722_v8, %v681_v58 }
 0x1f7   : > { %v715_v32 = vadd.f32 %v1722_v8, %v682_v26  ;;  %v658_v6 = vmul.f32 %v1697_v41, %v625_v17  ;;  %v687_v53 = vmul.f32 %v1706_v49, %v654_v31  ;;  %v716_v36 = vadd.f32 %v1722_v8, %v683_v46 }
 0x1f8   : > { %v659_v39 = vmul.f32 %v1697_v41, %v626_v23  ;;  %v688_v11 = vmul.f32 %v1706_v49, %v655_v21  ;;  %v717_v59 = vadd.f32 %v1722_v8, %v684_v63  ;;  %745 = vst [vmem:[%s1764_s21] sm:$0xff] %v713_v30  ;;  %v660_v57 = vmul.f32 %v1697_v41, %v627_v33 }
 0x1f9   : > { %v689_v18 = vmul.f32 %v1706_v49, %v656_v43  ;;  %v718_v52 = vadd.f32 %v1722_v8, %v685_v48  ;;  %746 = vst [vmem:[%s1764_s21 + $0x8] sm:$0xff] %v714_v56  ;;  %v630_v54 = vsub.f32 %v1581_v28, %v1695_v0  ;;  %v661_v60 = vmul.f32 %v1697_v41, %v628_v37 }
 0x1fa   : > { %v690_v1 = vmul.f32 %v1706_v49, %v657_v16  ;;  %v719_v3 = vadd.f32 %v1722_v8, %v686_v50  ;;  %747 = vst [vmem:[%s1764_s21 + $0x10] sm:$0xff] %v715_v32  ;;  %v662_v4 = vmul.f32 %v1697_v41, %v629_v10  ;;  %v691_v2 = vmul.f32 %v1706_v49, %v658_v6 }
 0x1fb   : > { %v720_v5 = vadd.f32 %v1722_v8, %v687_v53  ;;  %748 = vst [vmem:[%s1764_s21 + $0x18] sm:$0xff] %v716_v36  ;;  %v632_v28 = vsub.f32 %v1597_v42, %v1695_v0  ;;  %v663_v15 = vmul.f32 %v1697_v41, %v630_v54  ;;  %v692_v7 = vmul.f32 %v1706_v49, %v659_v39 }
 0x1fc   : > { %v721_v14 = vadd.f32 %v1722_v8, %v688_v11  ;;  %749 = vst [vmem:[%s1764_s21 + $0x20] sm:$0xff] %v717_v59  ;;  %v664_v9 = vmul.f32 %v1697_v41, %v631_v27  ;;  %v693_v55 = vmul.f32 %v1706_v49, %v660_v57  ;;  %v722_v20 = vadd.f32 %v1722_v8, %v689_v18 }
 0x1fd   : > { %750 = vst [vmem:[%s1764_s21 + $0x28] sm:$0xff] %v718_v52  ;;  %v634_v42 = vsub.f32 %v1613_v22, %v1695_v0  ;;  %v665_v12 = vmul.f32 %v1697_v41, %v632_v28  ;;  %v694_v58 = vmul.f32 %v1706_v49, %v661_v60  ;;  %v723_v26 = vadd.f32 %v1722_v8, %v690_v1 }
 0x1fe   : > { %751 = vst [vmem:[%s1764_s21 + $0x30] sm:$0xff] %v719_v3  ;;  %v666_v61 = vmul.f32 %v1697_v41, %v633_v34  ;;  %v695_v47 = vmul.f32 %v1706_v49, %v662_v4  ;;  %v724_v31 = vadd.f32 %v1722_v8, %v691_v2  ;;  %v636_v22 = vsub.f32 %v1623_v19, %v1695_v0 }
 0x1ff   : > { %752 = vst [vmem:[%s1764_s21 + $0x38] sm:$0xff] %v720_v5  ;;  %v667_v46 = vmul.f32 %v1697_v41, %v634_v42  ;;  %v696_v17 = vmul.f32 %v1706_v49, %v663_v15  ;;  %v725_v21 = vadd.f32 %v1722_v8, %v692_v7  ;;  %v668_v63 = vmul.f32 %v1697_v41, %v635_v45 }
 0x200   : > { %753 = vst [vmem:[%s1764_s21 + $0x40] sm:$0xff] %v721_v14  ;;  %v697_v23 = vmul.f32 %v1706_v49, %v664_v9  ;;  %v726_v43 = vadd.f32 %v1722_v8, %v693_v55  ;;  %v638_v19 = vsub.f32 %v1639_v35, %v1695_v0  ;;  %v669_v16 = vmul.f32 %v1697_v41, %v636_v22 }
 0x201   : > { %754 = vst [vmem:[%s1764_s21 + $0x48] sm:$0xff] %v722_v20  ;;  %v698_v48 = vmul.f32 %v1706_v49, %v665_v12  ;;  %v727_v50 = vadd.f32 %v1722_v8, %v694_v58  ;;  %v670_v30 = vmul.f32 %v1697_v41, %v637_v13  ;;  %v699_v56 = vmul.f32 %v1706_v49, %v666_v61 }
 0x202   : > { %755 = vst [vmem:[%s1764_s21 + $0x50] sm:$0xff] %v723_v26  ;;  %v728_v32 = vadd.f32 %v1722_v8, %v695_v47  ;;  %v640_v35 = vsub.f32 %v1653_v44, %v1695_v0  ;;  %v671_v33 = vmul.f32 %v1697_v41, %v638_v19  ;;  %v700_v6 = vmul.f32 %v1706_v49, %v667_v46 }
 0x203   : > { %756 = vst [vmem:[%s1764_s21 + $0x58] sm:$0xff] %v724_v31  ;;  %v729_v53 = vadd.f32 %v1722_v8, %v696_v17  ;;  %v672_v36 = vmul.f32 %v1697_v41, %v639_v29  ;;  %v701_v37 = vmul.f32 %v1706_v49, %v668_v63  ;;  %v730_v39 = vadd.f32 %v1722_v8, %v697_v23 }
 0x204   : > { %757 = vst [vmem:[%s1764_s21 + $0x60] sm:$0xff] %v725_v21  ;;  %v642_v44 = vsub.f32 %v1665_v51, %v1695_v0  ;;  %v673_v11 = vmul.f32 %v1697_v41, %v640_v35  ;;  %v702_v59 = vmul.f32 %v1706_v49, %v669_v16  ;;  %v731_v10 = vadd.f32 %v1722_v8, %v698_v48 }
 0x205   : > { %758 = vst [vmem:[%s1764_s21 + $0x68] sm:$0xff] %v726_v43  ;;  %v674_v57 = vmul.f32 %v1697_v41, %v641_v40  ;;  %v703_v18 = vmul.f32 %v1706_v49, %v670_v30  ;;  %v732_v52 = vadd.f32 %v1722_v8, %v699_v56  ;;  %v644_v51 = vsub.f32 %v1681_v24, %v1695_v0 }
 0x206   : > { %759 = vst [vmem:[%s1764_s21 + $0x70] sm:$0xff] %v727_v50  ;;  %v675_v54 = vmul.f32 %v1697_v41, %v642_v44  ;;  %v704_v60 = vmul.f32 %v1706_v49, %v671_v33  ;;  %v733_v1 = vadd.f32 %v1722_v8, %v700_v6  ;;  %v676_v3 = vmul.f32 %v1697_v41, %v643_v62 }
 0x207   : > { %760 = vst [vmem:[%s1764_s21 + $0x78] sm:$0xff] %v728_v32  ;;  %v705_v27 = vmul.f32 %v1706_v49, %v672_v36  ;;  %v734_v4 = vadd.f32 %v1722_v8, %v701_v37  ;;  %v677_v24 = vmul.f32 %v1697_v41, %v644_v51  ;;  %v706_v2 = vmul.f32 %v1706_v49, %v673_v11 }
 0x208   : > { %761 = vst [vmem:[%s1764_s21 + $0x80] sm:$0xff] %v729_v53  ;;  %v735_v5 = vadd.f32 %v1722_v8, %v702_v59  ;;  %v678_v28 = vmul.f32 %v1697_v41, %v645_v38  ;;  %v707_v25 = vmul.f32 %v1706_v49, %v674_v57  ;;  %v736_v0 = vadd.f32 %v1722_v8, %v703_v18 }
 0x209   : > { %762 = vst [vmem:[%s1764_s21 + $0x88] sm:$0xff] %v730_v39  ;;  %v708_v15 = vmul.f32 %v1706_v49, %v675_v54  ;;  %v737_v7 = vadd.f32 %v1722_v8, %v704_v60  ;;  %v709_v14 = vmul.f32 %v1706_v49, %v676_v3  ;;  %v738_v34 = vadd.f32 %v1722_v8, %v705_v27 }
 0x20a   : > { %763 = vst [vmem:[%s1764_s21 + $0x90] sm:$0xff] %v731_v10  ;;  %v710_v41 = vmul.f32 %v1706_v49, %v677_v24  ;;  %v739_v9 = vadd.f32 %v1722_v8, %v706_v2  ;;  %v711_v55 = vmul.f32 %v1706_v49, %v678_v28  ;;  %v740_v20 = vadd.f32 %v1722_v8, %v707_v25 }
 0x20b   : > { %764 = vst [vmem:[%s1764_s21 + $0x98] sm:$0xff] %v732_v52  ;;  %v741_v42 = vadd.f32 %v1722_v8, %v708_v15  ;;  %v742_v12 = vadd.f32 %v1722_v8, %v709_v14 }
 0x20c   : > { %765 = vst [vmem:[%s1764_s21 + $0xa0] sm:$0xff] %v733_v1  ;;  %v743_v58 = vadd.f32 %v1722_v8, %v710_v41  ;;  %v744_v49 = vadd.f32 %v1722_v8, %v711_v55 }
 0x20d   : > { %766 = vst [vmem:[%s1764_s21 + $0xa8] sm:$0xff] %v734_v4 }
 0x20e   : > { %767 = vst [vmem:[%s1764_s21 + $0xb0] sm:$0xff] %v735_v5 }
 0x20f   : > { %768 = vst [vmem:[%s1764_s21 + $0xb8] sm:$0xff] %v736_v0 }
 0x210   : > { %769 = vst [vmem:[%s1764_s21 + $0xc0] sm:$0xff] %v737_v7 }
 0x211   : > { %770 = vst [vmem:[%s1764_s21 + $0xc8] sm:$0xff] %v738_v34 }
 0x212   : > { %771 = vst [vmem:[%s1764_s21 + $0xd0] sm:$0xff] %v739_v9 }
 0x213   : > { %772 = vst [vmem:[%s1764_s21 + $0xd8] sm:$0xff] %v740_v20 }
 0x214   : > { %773 = vst [vmem:[%s1764_s21 + $0xe0] sm:$0xff] %v741_v42 }
 0x215   : > { %774 = vst [vmem:[%s1764_s21 + $0xe8] sm:$0xff] %v742_v12 }
 0x216   : > { %775 = vst [vmem:[%s1764_s21 + $0xf0] sm:$0xff] %v743_v58 }
 0x217   : > { %776 = vst [vmem:[%s1764_s21 + $0xf8] sm:$0xff] %v744_v49 }
 0x218   : > { %1198 = shalt.err (!%p1195_p10)
}
 0x219   : > { %s1253_s30 = smov 128   ;;  %s1254_s24 = smov 8  }
 0x21a   : > { %979 = dma.vmem_to_hbm [thread:$0]  (%p1368_p3), %s791_s11, 4096, %s793_s13, %s778_s14, %s1253_s30, %s1253_s30, %s1254_s24  }
 0x21b PF: > { %s807_s25 = sand.u32 1, %s1233_s15   ;;  %p1946_p12 = scmp.ge.s32.totalorder %s1245_s18, 2 }
 0x21c   : > { %s808_s21 = scalar_lea.sflag [#allocation4], %s807_s25 }
 0x21d   : > { %p996_p13 = pnand %p1946_p12, %p1315_p6 }
 0x21f   : > { %p997_p0 = pneg %p996_p13 }
 0x221   : > { %1228 = dma.done.wait (%p997_p0), %s808_s21, 4096  }
 0x222   : > { %1230 = vsyncadd (%p997_p0), %s808_s21, 4294963200  ;;  %p19_p5 = scmp.ge.s32.totalorder %s1350_s23, 4   ;;  %s1947_s15 = smov %s1237_s16 }
 0x223   : > { %s1948_s16 = smov %s1241_s17  ;;  %s1949_s17 = smov %s1364_s27 }
 0x224   : > { %s1950_s18 = smov %s1350_s23  ;;  %21 = sbr.rel (!%p19_p5) target bundleno = 7 (0x7), region = 93 }
 0x229   :  { %814 = vsyncpa [#allocation3], 1 }
 0x22a   :  { %816 = vsyncpa [#allocation3 + $0x1], 1 }
 0x22b   :  { %817 = vsyncpa [#allocation6], 1 }
 0x22c   :  { %818 = vsyncpa [#allocation9], 1 }
 0x22d   :  { %819 = vsyncpa [#allocation4], 1 }
 0x22e   :  { %821 = vsyncpa [#allocation4 + $0x1], 1 }

</bundles_post_ra>
